<compile_context>
chip_gen: v5e
topology: v5e:2x2
jax: 0.10.0
libtpu: 0.0.40
codegen_flags: <defaults>
</compile_context>

<pallas_src>
import jax
import jax.numpy as jnp
from jax import lax
from jax.experimental import pallas as pl
from jax.experimental.pallas import tpu as pltpu

ALPHA = 20.0
BETA = 10.0
_EPS_NSQ = 1e-24   # clamp on ||q||^2 (~1e-12 on ||q||); also makes padded columns exact zeros
_NUM_CORES = 2     # v7x: 2 TCs/chip; on 1-TC v5e/v6e the size-2 "parallel" axis is a no-op loop
_MAX_ROWS = 512    # rows (of 128 lanes) per tile -> up to 64K batch elements per grid step


def _round_up(x, m):
    return ((x + m - 1) // m) * m


def _fusion_kernel(x_ref, out_ref, acc_ref):
    """x_ref: (14, TR, 128) f32.  Leading-axis rows:
         0..6  = predicted [px, py, pz, qw, qx, qy, qz]
         7..13 = actual    [px, py, pz, qw, qx, qy, qz]
    out_ref: (1, 2, 8, 128) per-core lane partials; acc_ref: (2, TR, 128) VMEM scratch."""
    j = pl.program_id(1)

    @pl.when(j == 0)
    def _init():
        acc_ref[...] = jnp.zeros_like(acc_ref)

    # ---------------- position loss contribution (L1), summed over the 3 components ----
    pos = (jnp.abs(x_ref[0] - x_ref[7])
           + jnp.abs(x_ref[1] - x_ref[8])
           + jnp.abs(x_ref[2] - x_ref[9]))                 # (TR, 128)

    # ---------------- orientation loss contribution (QME) ----------------
    a1, b1, c1, d1 = x_ref[3], x_ref[4], x_ref[5], x_ref[6]          # raw predicted quaternion
    a2, b2, c2, d2 = x_ref[10], -x_ref[11], -x_ref[12], -x_ref[13]   # conj(true quaternion)

    # Hamilton product (imaginary components only).
    q2 = a1 * b2 + b1 * a2 + c1 * d2 - d1 * c2
    q3 = a1 * c2 - b1 * d2 + c1 * a2 + d1 * b2
    q4 = a1 * d2 + b1 * c2 - c1 * b2 + d1 * a2

    # |.| is homogeneous -> normalize once via rsqrt of the RAW squared norm (EUP op).
    s = jnp.abs(q2) + jnp.abs(q3) + jnp.abs(q4)                       # (TR, 128)
    nsq = a1 * a1 + b1 * b1 + c1 * c1 + d1 * d1                       # (TR, 128)
    inv_norm = lax.rsqrt(jnp.maximum(nsq, jnp.float32(_EPS_NSQ)))
    qme = 2.0 * s * inv_norm                                          # (TR, 128)

    # Zero-padded batch columns contribute exactly 0 (|0-0|=0; s=0 => qme=0) -> no mask.
    acc_ref[0] += pos
    acc_ref[1] += qme

    @pl.when(j == pl.num_programs(1) - 1)
    def _finalize():
        tr = acc_ref.shape[1]
        # Fold TR sublane-rows -> 8 with VALU-only adds; single lane-dense output block.
        out_ref[0, 0] = jnp.sum(acc_ref[0].reshape(tr // 8, 8, 128), axis=0)
        out_ref[0, 1] = jnp.sum(acc_ref[1].reshape(tr // 8, 8, 128), axis=0)


def fusion_criterion(predicted, actual, *, small_batch_fallback=False, max_rows=_MAX_ROWS):
    """predicted, actual: float32 [B, 7]. Returns scalar total loss."""
    B, D = predicted.shape
    assert D == 7 and actual.shape == (B, D)
    assert max_rows % 8 == 0

    if small_batch_fallback and B < 4096:
        # At tiny batch sizes the whole loss is launch-bound; one XLA fusion is as fast.
        return _reference(predicted, actual)

    rows_needed = pl.cdiv(B, 128)                                   # 128-lane rows of batch
    tr = min(max_rows, _round_up(pl.cdiv(rows_needed, _NUM_CORES), 8))
    rows_pad = _round_up(rows_needed, _NUM_CORES * tr)
    steps = rows_pad // tr // _NUM_CORES                            # grid steps per core
    b_pad = rows_pad * 128

    # Fuse pred/act into one (14, rows_pad, 128) operand: components on the leading axis,
    # batch lane-dense on the trailing (rows, 128) axes.  allow_input_fusion lets XLA fold
    # this transpose/pad/reshape into the pallas_call input where possible.
    # TODO(synk): produce this transposed layout upstream of the loss to avoid the extra HBM pass.
    fused = jnp.concatenate(
        [predicted.astype(jnp.float32).T, actual.astype(jnp.float32).T], axis=0)  # (14, B)
    fused = jnp.pad(fused, ((0, 0), (0, b_pad - B))).reshape(14, rows_pad, 128)

    partials = pl.pallas_call(
        _fusion_kernel,
        out_shape=jax.ShapeDtypeStruct((_NUM_CORES, 2, 8, 128), jnp.float32),
        grid_spec=pltpu.PrefetchScalarGridSpec(
            num_scalar_prefetch=0,
            grid=(_NUM_CORES, steps),
            in_specs=[
                pl.BlockSpec((14, tr, 128), lambda i, j: (0, i * steps + j, 0)),
            ],
            out_specs=pl.BlockSpec((1, 2, 8, 128), lambda i, j: (i, 0, 0, 0)),
            scratch_shapes=[pltpu.VMEM((2, tr, 128), jnp.float32)],
        ),
        compiler_params=pltpu.CompilerParams(
            dimension_semantics=("parallel", "arbitrary"),   # shard over 2 TCs on v7x
            vmem_limit_bytes=32 * 1024 * 1024,
            allow_input_fusion=[True],
        ),
        cost_estimate=pl.CostEstimate(
            flops=40 * B,
            transcendentals=B,
            bytes_accessed=14 * b_pad * 4 + _NUM_CORES * 2 * 8 * 128 * 4,
        ),
    )(fused)

    # Tiny epilogue: combine per-core lane partials, divide by true batch, mix losses.
    pos_sum = jnp.sum(partials[:, 0])
    qme_sum = jnp.sum(partials[:, 1])
    position_loss = pos_sum / jnp.float32(B * 3)
    orientation_loss = qme_sum / jnp.float32(B)
    return ALPHA * position_loss + BETA * orientation_loss


def _reference(predicted, actual):
    # Pure-JAX reference mirroring the PyTorch module.
    B = predicted.shape[0]
    pos_loss = jnp.mean(jnp.abs(predicted[:, :3] - actual[:, :3]))
    q = predicted[:, 3:]
    qn = q / jnp.linalg.norm(q, axis=1, keepdims=True)
    a1, b1, c1, d1 = qn[:, 0], qn[:, 1], qn[:, 2], qn[:, 3]
    t = actual[:, 3:] * jnp.array([1.0, -1.0, -1.0, -1.0])
    a2, b2, c2, d2 = t[:, 0], t[:, 1], t[:, 2], t[:, 3]
    q2 = a1 * b2 + b1 * a2 + c1 * d2 - d1 * c2
    q3 = a1 * c2 - b1 * d2 + c1 * a2 + d1 * b2
    q4 = a1 * d2 + b1 * c2 - c1 * b2 + d1 * a2
    qme = 2.0 * (jnp.abs(q2) + jnp.abs(q3) + jnp.abs(q4))
    ori_loss = jnp.sum(qme) / B
    return ALPHA * pos_loss + BETA * ori_loss


def _make_inputs(key, B):
    k1, k2 = jax.random.split(key)
    predicted = jax.random.normal(k1, (B, 7), dtype=jnp.float32)
    actual = jax.random.normal(k2, (B, 7), dtype=jnp.float32)
    # Ground-truth quaternion part is typically unit-norm.
    actual = actual.at[:, 3:].set(
        actual[:, 3:] / jnp.linalg.norm(actual[:, 3:], axis=1, keepdims=True)
    )
    return predicted, actual


def _check(got, ref):
    assert jnp.allclose(got, ref, rtol=1e-4, atol=1e-4), (got, ref)


if __name__ == "__main__":
    key = jax.random.PRNGKey(0)

    # Small case (single grid step per core, heavy padding).
    pred_s, act_s = _make_inputs(key, 8)
    total_s = fusion_criterion(pred_s, act_s)
    jax.block_until_ready(total_s)
    _check(total_s, _reference(pred_s, act_s))

    # Partial last tile (exercises zero-padding of batch columns).
    pred_m, act_m = _make_inputs(jax.random.PRNGKey(1), 300)
    total_m = fusion_criterion(pred_m, act_m)
    jax.block_until_ready(total_m)
    _check(total_m, _reference(pred_m, act_m))

    # Multi-step accumulation per core (small max_rows forces steps > 1 on the arbitrary axis).
    pred_l, act_l = _make_inputs(jax.random.PRNGKey(2), 4000)
    total_l = fusion_criterion(pred_l, act_l, max_rows=8)
    jax.block_until_ready(total_l)
    _check(total_l, _reference(pred_l, act_l))

    print("KERNEL_OK")
</pallas_src>

<mosaic_0001>
module attributes {stable_mosaic.version = 11 : i64} {
  func.func @_fusion_kernel(%arg0: i32, %arg1: i32, %arg2: memref<14x8x128xf32, #tpu.memory_space<vmem>>, %arg3: memref<1x2x8x128xf32, #tpu.memory_space<vmem>>, %arg4: memref<2x8x128xf32, #tpu.memory_space<vmem>>) attributes {dimension_semantics = [#tpu.dimension_semantics<parallel>, #tpu.dimension_semantics<arbitrary>], iteration_bounds = array<i64: 2, 1>, scalar_prefetch = 0 : i64, scratch_operands = 1 : i64, tpu.core_type = #tpu.core_type<tc>, window_params = [{transform_indices = @transform_0, window_bounds = array<i64: 14, 8, 128>}, {transform_indices = @transform_1, window_bounds = array<i64: 1, 2, 8, 128>}]} {
    %c0_i32 = arith.constant 0 : i32
    %0 = arith.cmpi eq, %arg1, %c0_i32 : i32
    %1 = arith.extui %0 : i1 to i32
    %c0_i32_0 = arith.constant 0 : i32
    %2 = arith.cmpi ne, %1, %c0_i32_0 : i32
    scf.if %2 {
      %cst_47 = arith.constant 0.000000e+00 : f32
      %99 = vector.broadcast %cst_47 : f32 to vector<2x8x128xf32>
      %c0_48 = arith.constant 0 : index
      %c0_49 = arith.constant 0 : index
      %c0_50 = arith.constant 0 : index
      %100 = vector.load %arg4[%c0_48, %c0_49, %c0_50] : memref<2x8x128xf32, #tpu.memory_space<vmem>>, vector<2x8x128xf32>
      tpu.vector_store %arg4[%c0_48, %c0_49, %c0_50], %99 {strides = array<i32>} : memref<2x8x128xf32, #tpu.memory_space<vmem>>, vector<2x8x128xf32>,
    } else {
    }
    %c0 = arith.constant 0 : index
    %c0_1 = arith.constant 0 : index
    %c0_2 = arith.constant 0 : index
    %3 = vector.load %arg2[%c0, %c0_1, %c0_2] : memref<14x8x128xf32, #tpu.memory_space<vmem>>, vector<1x8x128xf32>
    %4 = vector.shape_cast %3 : vector<1x8x128xf32> to vector<8x128xf32>
    %c7 = arith.constant 7 : index
    %c0_3 = arith.constant 0 : index
    %c0_4 = arith.constant 0 : index
    %5 = vector.load %arg2[%c7, %c0_3, %c0_4] : memref<14x8x128xf32, #tpu.memory_space<vmem>>, vector<1x8x128xf32>
    %6 = vector.shape_cast %5 : vector<1x8x128xf32> to vector<8x128xf32>
    %7 = arith.subf %4, %6 : vector<8x128xf32>
    %8 = math.absf %7 : vector<8x128xf32>
    %c1 = arith.constant 1 : index
    %c0_5 = arith.constant 0 : index
    %c0_6 = arith.constant 0 : index
    %9 = vector.load %arg2[%c1, %c0_5, %c0_6] : memref<14x8x128xf32, #tpu.memory_space<vmem>>, vector<1x8x128xf32>
    %10 = vector.shape_cast %9 : vector<1x8x128xf32> to vector<8x128xf32>
    %c8 = arith.constant 8 : index
    %c0_7 = arith.constant 0 : index
    %c0_8 = arith.constant 0 : index
    %11 = vector.load %arg2[%c8, %c0_7, %c0_8] : memref<14x8x128xf32, #tpu.memory_space<vmem>>, vector<1x8x128xf32>
    %12 = vector.shape_cast %11 : vector<1x8x128xf32> to vector<8x128xf32>
    %13 = arith.subf %10, %12 : vector<8x128xf32>
    %14 = math.absf %13 : vector<8x128xf32>
    %15 = arith.addf %8, %14 : vector<8x128xf32>
    %c2 = arith.constant 2 : index
    %c0_9 = arith.constant 0 : index
    %c0_10 = arith.constant 0 : index
    %16 = vector.load %arg2[%c2, %c0_9, %c0_10] : memref<14x8x128xf32, #tpu.memory_space<vmem>>, vector<1x8x128xf32>
    %17 = vector.shape_cast %16 : vector<1x8x128xf32> to vector<8x128xf32>
    %c9 = arith.constant 9 : index
    %c0_11 = arith.constant 0 : index
    %c0_12 = arith.constant 0 : index
    %18 = vector.load %arg2[%c9, %c0_11, %c0_12] : memref<14x8x128xf32, #tpu.memory_space<vmem>>, vector<1x8x128xf32>
    %19 = vector.shape_cast %18 : vector<1x8x128xf32> to vector<8x128xf32>
    %20 = arith.subf %17, %19 : vector<8x128xf32>
    %21 = math.absf %20 : vector<8x128xf32>
    %22 = arith.addf %15, %21 : vector<8x128xf32>
    %c3 = arith.constant 3 : index
    %c0_13 = arith.constant 0 : index
    %c0_14 = arith.constant 0 : index
    %23 = vector.load %arg2[%c3, %c0_13, %c0_14] : memref<14x8x128xf32, #tpu.memory_space<vmem>>, vector<1x8x128xf32>
    %24 = vector.shape_cast %23 : vector<1x8x128xf32> to vector<8x128xf32>
    %c4 = arith.constant 4 : index
    %c0_15 = arith.constant 0 : index
    %c0_16 = arith.constant 0 : index
    %25 = vector.load %arg2[%c4, %c0_15, %c0_16] : memref<14x8x128xf32, #tpu.memory_space<vmem>>, vector<1x8x128xf32>
    %26 = vector.shape_cast %25 : vector<1x8x128xf32> to vector<8x128xf32>
    %c5 = arith.constant 5 : index
    %c0_17 = arith.constant 0 : index
    %c0_18 = arith.constant 0 : index
    %27 = vector.load %arg2[%c5, %c0_17, %c0_18] : memref<14x8x128xf32, #tpu.memory_space<vmem>>, vector<1x8x128xf32>
    %28 = vector.shape_cast %27 : vector<1x8x128xf32> to vector<8x128xf32>
    %c6 = arith.constant 6 : index
    %c0_19 = arith.constant 0 : index
    %c0_20 = arith.constant 0 : index
    %29 = vector.load %arg2[%c6, %c0_19, %c0_20] : memref<14x8x128xf32, #tpu.memory_space<vmem>>, vector<1x8x128xf32>
    %30 = vector.shape_cast %29 : vector<1x8x128xf32> to vector<8x128xf32>
    %c10 = arith.constant 10 : index
    %c0_21 = arith.constant 0 : index
    %c0_22 = arith.constant 0 : index
    %31 = vector.load %arg2[%c10, %c0_21, %c0_22] : memref<14x8x128xf32, #tpu.memory_space<vmem>>, vector<1x8x128xf32>
    %32 = vector.shape_cast %31 : vector<1x8x128xf32> to vector<8x128xf32>
    %c11 = arith.constant 11 : index
    %c0_23 = arith.constant 0 : index
    %c0_24 = arith.constant 0 : index
    %33 = vector.load %arg2[%c11, %c0_23, %c0_24] : memref<14x8x128xf32, #tpu.memory_space<vmem>>, vector<1x8x128xf32>
    %34 = vector.shape_cast %33 : vector<1x8x128xf32> to vector<8x128xf32>
    %cst = arith.constant 0.000000e+00 : f32
    %35 = vector.broadcast %cst : f32 to vector<8x128xf32>
    %36 = arith.subf %35, %34 : vector<8x128xf32>
    %c12 = arith.constant 12 : index
    %c0_25 = arith.constant 0 : index
    %c0_26 = arith.constant 0 : index
    %37 = vector.load %arg2[%c12, %c0_25, %c0_26] : memref<14x8x128xf32, #tpu.memory_space<vmem>>, vector<1x8x128xf32>
    %38 = vector.shape_cast %37 : vector<1x8x128xf32> to vector<8x128xf32>
    %cst_27 = arith.constant 0.000000e+00 : f32
    %39 = vector.broadcast %cst_27 : f32 to vector<8x128xf32>
    %40 = arith.subf %39, %38 : vector<8x128xf32>
    %c13 = arith.constant 13 : index
    %c0_28 = arith.constant 0 : index
    %c0_29 = arith.constant 0 : index
    %41 = vector.load %arg2[%c13, %c0_28, %c0_29] : memref<14x8x128xf32, #tpu.memory_space<vmem>>, vector<1x8x128xf32>
    %42 = vector.shape_cast %41 : vector<1x8x128xf32> to vector<8x128xf32>
    %cst_30 = arith.constant 0.000000e+00 : f32
    %43 = vector.broadcast %cst_30 : f32 to vector<8x128xf32>
    %44 = arith.subf %43, %42 : vector<8x128xf32>
    %45 = arith.mulf %24, %36 : vector<8x128xf32>
    %46 = arith.mulf %26, %32 : vector<8x128xf32>
    %47 = arith.addf %45, %46 : vector<8x128xf32>
    %48 = arith.mulf %28, %44 : vector<8x128xf32>
    %49 = arith.addf %47, %48 : vector<8x128xf32>
    %50 = arith.mulf %30, %40 : vector<8x128xf32>
    %51 = arith.subf %49, %50 : vector<8x128xf32>
    %52 = arith.mulf %24, %40 : vector<8x128xf32>
    %53 = arith.mulf %26, %44 : vector<8x128xf32>
    %54 = arith.subf %52, %53 : vector<8x128xf32>
    %55 = arith.mulf %28, %32 : vector<8x128xf32>
    %56 = arith.addf %54, %55 : vector<8x128xf32>
    %57 = arith.mulf %30, %36 : vector<8x128xf32>
    %58 = arith.addf %56, %57 : vector<8x128xf32>
    %59 = arith.mulf %24, %44 : vector<8x128xf32>
    %60 = arith.mulf %26, %40 : vector<8x128xf32>
    %61 = arith.addf %59, %60 : vector<8x128xf32>
    %62 = arith.mulf %28, %36 : vector<8x128xf32>
    %63 = arith.subf %61, %62 : vector<8x128xf32>
    %64 = arith.mulf %30, %32 : vector<8x128xf32>
    %65 = arith.addf %63, %64 : vector<8x128xf32>
    %66 = math.absf %51 : vector<8x128xf32>
    %67 = math.absf %58 : vector<8x128xf32>
    %68 = arith.addf %66, %67 : vector<8x128xf32>
    %69 = math.absf %65 : vector<8x128xf32>
    %70 = arith.addf %68, %69 : vector<8x128xf32>
    %71 = arith.mulf %24, %24 : vector<8x128xf32>
    %72 = arith.mulf %26, %26 : vector<8x128xf32>
    %73 = arith.addf %71, %72 : vector<8x128xf32>
    %74 = arith.mulf %28, %28 : vector<8x128xf32>
    %75 = arith.addf %73, %74 : vector<8x128xf32>
    %76 = arith.mulf %30, %30 : vector<8x128xf32>
    %77 = arith.addf %75, %76 : vector<8x128xf32>
    %cst_31 = arith.constant 1.000000e-24 : f32
    %78 = vector.broadcast %cst_31 : f32 to vector<8x128xf32>
    %79 = arith.maximumf %77, %78 : vector<8x128xf32>
    %80 = math.rsqrt %79 : vector<8x128xf32>
    %cst_32 = arith.constant 2.000000e+00 : f32
    %81 = vector.broadcast %cst_32 : f32 to vector<8x128xf32>
    %82 = arith.mulf %81, %70 : vector<8x128xf32>
    %83 = arith.mulf %82, %80 : vector<8x128xf32>
    %c0_33 = arith.constant 0 : index
    %c0_34 = arith.constant 0 : index
    %c0_35 = arith.constant 0 : index
    %84 = vector.load %arg4[%c0_33, %c0_34, %c0_35] : memref<2x8x128xf32, #tpu.memory_space<vmem>>, vector<1x8x128xf32>
    %85 = vector.shape_cast %84 : vector<1x8x128xf32> to vector<8x128xf32>
    %86 = arith.addf %85, %22 : vector<8x128xf32>
    %c0_36 = arith.constant 0 : index
    %c0_37 = arith.constant 0 : index
    %c0_38 = arith.constant 0 : index
    %87 = vector.load %arg4[%c0_36, %c0_37, %c0_38] : memref<2x8x128xf32, #tpu.memory_space<vmem>>, vector<1x8x128xf32>
    %88 = vector.shape_cast %87 : vector<1x8x128xf32> to vector<8x128xf32>
    %89 = vector.shape_cast %86 : vector<8x128xf32> to vector<1x8x128xf32>
    tpu.vector_store %arg4[%c0_36, %c0_37, %c0_38], %89 {strides = array<i32>} : memref<2x8x128xf32, #tpu.memory_space<vmem>>, vector<1x8x128xf32>,
    %c1_39 = arith.constant 1 : index
    %c0_40 = arith.constant 0 : index
    %c0_41 = arith.constant 0 : index
    %90 = vector.load %arg4[%c1_39, %c0_40, %c0_41] : memref<2x8x128xf32, #tpu.memory_space<vmem>>, vector<1x8x128xf32>
    %91 = vector.shape_cast %90 : vector<1x8x128xf32> to vector<8x128xf32>
    %92 = arith.addf %91, %83 : vector<8x128xf32>
    %c1_42 = arith.constant 1 : index
    %c0_43 = arith.constant 0 : index
    %c0_44 = arith.constant 0 : index
    %93 = vector.load %arg4[%c1_42, %c0_43, %c0_44] : memref<2x8x128xf32, #tpu.memory_space<vmem>>, vector<1x8x128xf32>
    %94 = vector.shape_cast %93 : vector<1x8x128xf32> to vector<8x128xf32>
    %95 = vector.shape_cast %92 : vector<8x128xf32> to vector<1x8x128xf32>
    tpu.vector_store %arg4[%c1_42, %c0_43, %c0_44], %95 {strides = array<i32>} : memref<2x8x128xf32, #tpu.memory_space<vmem>>, vector<1x8x128xf32>,
    %c0_i32_45 = arith.constant 0 : i32
    %96 = arith.cmpi eq, %arg1, %c0_i32_45 : i32
    %97 = arith.extui %96 : i1 to i32
    %c0_i32_46 = arith.constant 0 : i32
    %98 = arith.cmpi ne, %97, %c0_i32_46 : i32
    scf.if %98 {
      %c0_47 = arith.constant 0 : index
      %c0_48 = arith.constant 0 : index
      %c0_49 = arith.constant 0 : index
      %99 = vector.load %arg4[%c0_47, %c0_48, %c0_49] : memref<2x8x128xf32, #tpu.memory_space<vmem>>, vector<1x8x128xf32>
      %100 = vector.shape_cast %99 : vector<1x8x128xf32> to vector<8x128xf32>
      %101 = vector.shape_cast %100 : vector<8x128xf32> to vector<1x8x128xf32>
      %cst_50 = arith.constant dense<0.000000e+00> : vector<8x128xf32>
      %102 = vector.multi_reduction <add>, %101, %cst_50 [0] : vector<1x8x128xf32> to vector<8x128xf32>
      %c0_51 = arith.constant 0 : index
      %c0_52 = arith.constant 0 : index
      %c0_53 = arith.constant 0 : index
      %c0_54 = arith.constant 0 : index
      %103 = vector.load %arg3[%c0_51, %c0_52, %c0_53, %c0_54] : memref<1x2x8x128xf32, #tpu.memory_space<vmem>>, vector<1x1x8x128xf32>
      %104 = vector.shape_cast %103 : vector<1x1x8x128xf32> to vector<8x128xf32>
      %105 = vector.shape_cast %102 : vector<8x128xf32> to vector<1x1x8x128xf32>
      tpu.vector_store %arg3[%c0_51, %c0_52, %c0_53, %c0_54], %105 {strides = array<i32>} : memref<1x2x8x128xf32, #tpu.memory_space<vmem>>, vector<1x1x8x128xf32>,
      %c1_55 = arith.constant 1 : index
      %c0_56 = arith.constant 0 : index
      %c0_57 = arith.constant 0 : index
      %106 = vector.load %arg4[%c1_55, %c0_56, %c0_57] : memref<2x8x128xf32, #tpu.memory_space<vmem>>, vector<1x8x128xf32>
      %107 = vector.shape_cast %106 : vector<1x8x128xf32> to vector<8x128xf32>
      %108 = vector.shape_cast %107 : vector<8x128xf32> to vector<1x8x128xf32>
      %cst_58 = arith.constant dense<0.000000e+00> : vector<8x128xf32>
      %109 = vector.multi_reduction <add>, %108, %cst_58 [0] : vector<1x8x128xf32> to vector<8x128xf32>
      %c0_59 = arith.constant 0 : index
      %c1_60 = arith.constant 1 : index
      %c0_61 = arith.constant 0 : index
      %c0_62 = arith.constant 0 : index
      %110 = vector.load %arg3[%c0_59, %c1_60, %c0_61, %c0_62] : memref<1x2x8x128xf32, #tpu.memory_space<vmem>>, vector<1x1x8x128xf32>
      %111 = vector.shape_cast %110 : vector<1x1x8x128xf32> to vector<8x128xf32>
      %112 = vector.shape_cast %109 : vector<8x128xf32> to vector<1x1x8x128xf32>
      tpu.vector_store %arg3[%c0_59, %c1_60, %c0_61, %c0_62], %112 {strides = array<i32>} : memref<1x2x8x128xf32, #tpu.memory_space<vmem>>, vector<1x1x8x128xf32>,
    } else {
    }
    return
  }
  func.func @transform_0(%arg0: i32, %arg1: i32) -> (i32, i32, i32) {
    %c1_i32 = arith.constant 1 : i32
    %0 = arith.muli %arg0, %c1_i32 : i32
    %1 = arith.addi %0, %arg1 : i32
    %c0_i32 = arith.constant 0 : i32
    %c0_i32_0 = arith.constant 0 : i32
    %c0_i32_1 = arith.constant 0 : i32
    return %c0_i32, %1, %c0_i32_0 : i32, i32, i32
  }
  func.func @transform_1(%arg0: i32, %arg1: i32) -> (i32, i32, i32, i32) {
    %c0_i32 = arith.constant 0 : i32
    %c0_i32_0 = arith.constant 0 : i32
    %c0_i32_1 = arith.constant 0 : i32
    %c0_i32_2 = arith.constant 0 : i32
    return %arg0, %c0_i32, %c0_i32_0, %c0_i32_1 : i32, i32, i32, i32
  }
}

</mosaic_0001>

<bundles_post_ra>
// kernel: tpu_custom_call.1
= control target key start
LH: loop header
LB: loop body
LE: loop exit
PB: predicated region body
PF: predicated region fallthrough
CT: control target
= control target key end

     0   :  { %6 = vsyncpa [#allocation4], 0  ;;  %s728_s0 = inlined_call_operand.hbm [shape: f32[14,16,128], index: 0, kind: input, shape index: {}]   ;;  %s729_s1 = inlined_call_operand.hbm [shape: f32[2,2,8,128], index: 1, kind: output, shape index: {}]  }
   0x1   :  { %8 = vsyncpa [#allocation4 + $0x1], 0 }
   0x2   :  { %9 = vsyncpa [#allocation5], 0 }
   0x3   :  { %11 = vsyncpa [#allocation5 + $0x1], 0  ;;  %s584_s6 = smov 0   ;;  %s586_s7 = smov 0  }
   0x4   :  { %s588_s8 = smov 0   ;;  %s590_s9 = smov 0  }
   0x5   :  { %s592_s10 = smov 0   ;;  %s594_s11 = smov 0  }
   0x6 LB: > { %s357_s12 = sadd.s32 4294967295, %s567_s11   ;;  %s358_s13 = sadd.s32 4294967294, %s567_s11   ;;  %s567_s11 = sphi %s594_s11, %s17_s11   ;;  %s563_s10 = sphi %s592_s10, %s738_s10   ;;  %s559_s9 = sphi %s590_s9, %s737_s9   ;;  %s555_s8 = sphi %s588_s8, %s736_s8   ;;  %s551_s7 = sphi %s586_s7, %s735_s7   ;;  %s547_s6 = sphi %s584_s6, %s734_s6  }
   0x7   : > { %s29_s14 = sadd.s32 1, %s563_s10  ;;  %s38_s15 = sadd.s32 1, %s555_s8 }
   0x8   : > { %p31_p0 = scmp.ge.s32.totalorder %s29_s14, 2  ;;  %p45_p1 = scmp.ne.s32.totalorder %s555_s8, %s551_s7 }
   0x9   : > { %p46_p2 = scmp.eq.s32.totalorder %s567_s11, 0  ;;  %p51_p3 = scmp.ne.s32.totalorder %s551_s7, %s547_s6 }
   0xa   : > { %s740_s14 = smov (%p31_p0, %s29_s14), 0  ;;  %p52_p5 = scmp.eq.s32.totalorder %s357_s12, 0 }
   0xb   : > { %p625_p4 = por %p46_p2, %p45_p1  ;;  %s35_s17 = ssub.s32 %s563_s10, %s740_s14 }
   0xc   : > { %p75_p6 = scmp.eq.s32.totalorder %s357_s12, 1  ;;  %p36_p7 = scmp.eq.s32.totalorder %s35_s17, 0 }
   0xd   : > { %p631_p8 = por %p52_p5, %p51_p3  ;;  %p81_p10 = scmp.eq.s32.totalorder %s358_s13, 1 }
   0xe   : > { %p635_p9 = por %p75_p6, %p45_p1  ;;  %p360_p12 = scmp.ge.s32.totalorder %s567_s11, 2 }
   0xf   : > { %s640_s20 = scalar_select %p36_p7, %s555_s8, %s38_s15  }
  0x10   : > { %p642_p11 = por %p81_p10, %p51_p3  ;;  %p398_p13 = scmp.lt.s32.totalorder %s567_s11, 2 }
  0x11   : > { %s101_s22 = sand.u32 1, %s555_s8   ;;  %s361_s24 = sshll.u32 %s563_s10, 3 }
  0x12   : > { %s384_s23 = smul.u32 112, %s101_s22  ;;  %p391_p0 = pnand %p398_p13, %p625_p4 }
  0x13   : > { %s110_s27 = scalar_lea.hbm %s728_s0, %s361_s24  ;;  %s102_s2 = scalar_lea.sflag [#allocation4], %s101_s22 }
  0x14   : > { %s111_s28 = sshll.u32 %s110_s27, 4  ;;  %s105_s29 = scalar_lea.vmem [#allocation3], %s384_s23  ;;  %s112_s28 = int_to_ptr.hbm [resolvable:$true] %s111_s28 }
  0x15   : > { %s113_s30 = sshll.u32 %s105_s29, 4  ;;  %s569_s3 = smov 256   ;;  %s114_s30 = int_to_ptr.vmem [resolvable:$true] %s113_s30 }
  0x16   : > { %s570_s4 = smov 128   ;;  %s571_s5 = smov 8  }
  0x17   : > { %393 = dma.hbm_to_vmem [thread:$0]  (!%p391_p0), %s112_s28, 1792, %s114_s30, %s102_s2, %s569_s3, %s570_s4, %s571_s5  }
  0x18   : > { %p362_p1 = scmp.ge.s32.totalorder %s567_s11, 1  ;;  %p121_p2 = scmp.lt.s32.totalorder %s567_s11, 3 }
  0x1a   : > { %p122_p3 = pnand %p362_p1, %p121_p2 }
  0x1b   : > { %s658_s12 = sand.u32 (!%p122_p3), 1, %s551_s7  }
  0x1c   : > { %125 = sbr.rel (%p122_p3) target bundleno = 73 (0x49), region = 24  ;;  %s128_s15 = scalar_lea.sflag (!%p122_p3), [#allocation4], %s658_s12 }
  0x1d   : > { %s385_s13 = smul.u32 (!%p122_p3), 112, %s658_s12 }
  0x1f   : > { %s662_s16 = scalar_lea.vmem (!%p122_p3), [#allocation3], %s385_s13 }
  0x21   : > { %538 = dma.done.wait (%p631_p8), %s128_s15, 1792  }
  0x22   : > { %540 = vsyncadd (%p631_p8), %s128_s15, 4294965504  ;;  %v158_v0 = vld [vmem:[%s662_s16] sm:$0xff]  ;;  %v364_v1 = vld [vmem:[%s662_s16 + $0x38] sm:$0xff]  ;;  %s363_s17 = sshll.u32 %s658_s12, 4  ;;  %s383_s22 = sshll.u32 %s559_s9, 4 }
  0x23   : > { %v365_v2 = vld [vmem:[%s662_s16 + $0x8] sm:$0xff]  ;;  %v161_v3 = vsub.f32 %v158_v0, %v364_v1  ;;  %v366_v4 = vld [vmem:[%s662_s16 + $0x40] sm:$0xff]  ;;  %v367_v5 = vld [vmem:[%s662_s16 + $0x10] sm:$0xff]  ;;  %s685_s18 = scalar_lea.vmem [#allocation6], %s363_s17  ;;  %s271_s25 = scalar_lea.hbm %s729_s1, %s383_s22 }
  0x24   : > { %v368_v6 = vld [vmem:[%s662_s16 + $0x48] sm:$0xff]  ;;  %v167_v7 = vsub.f32 %v365_v2, %v366_v4  ;;  %v369_v9 = vld [vmem:[%s662_s16 + $0x18] sm:$0xff]  ;;  %v370_v10 = vld [vmem:[%s662_s16 + $0x20] sm:$0xff]  ;;  %s272_s26 = sshll.u32 %s685_s18, 4  ;;  %s274_s27 = sshll.u32 %s271_s25, 4  ;;  %s273_s26 = int_to_ptr.vmem [resolvable:$true] %s272_s26  ;;  %s275_s27 = int_to_ptr.hbm [resolvable:$true] %s274_s27 }
  0x25   : > { %v174_v8 = vsub.f32 %v367_v5, %v368_v6  ;;  %v371_v11 = vld [vmem:[%s662_s16 + $0x28] sm:$0xff]  ;;  %v162_v12 = vand.u32 2147483647, %v161_v3  ;;  %v373_v13 = vld [vmem:[%s662_s16 + $0x50] sm:$0xff]  ;;  %v374_v14 = vld [vmem:[%s662_s16 + $0x58] sm:$0xff]  ;;  %v222_v15 = vmul.f32 %v369_v9, %v369_v9  ;;  %v223_v16 = vmul.f32 %v370_v10, %v370_v10  ;;  %s260_s9 = scalar_lea.sflag [#allocation5], %s658_s12 }
  0x26   : > { %v168_v17 = vand.u32 2147483647, %v167_v7  ;;  %v189_v19 = vsub.f32 0.0, %v374_v14  ;;  %v375_v20 = vld [vmem:[%s662_s16 + $0x60] sm:$0xff]  ;;  %v197_v21 = vmul.f32 %v373_v13, %v370_v10  ;;  %v376_v23 = vld [vmem:[%s662_s16 + $0x68] sm:$0xff]  ;;  %v225_v25 = vmul.f32 %v371_v11, %v371_v11  ;;  %v372_v27 = vld [vmem:[%s662_s16 + $0x30] sm:$0xff] }
  0x27   : > { %v175_v18 = vand.u32 2147483647, %v174_v8  ;;  %v192_v22 = vsub.f32 0.0, %v375_v20  ;;  %v224_v24 = vadd.f32 %v223_v16, %v222_v15  ;;  %v195_v28 = vsub.f32 0.0, %v376_v23  ;;  %s499_s28 = sshra.s32 %s275_s27, 4  ;;  %s505_s3 = scalar_lea.hbm %s729_s1, 32  ;;  %s500_s28 = int_to_ptr.hbm [resolvable:$true] %s499_s28 }
  0x28   : > { %v169_v26 = vadd.f32 %v168_v17, %v162_v12  ;;  %v196_v29 = vmul.f32 %v369_v9, %v189_v19  ;;  %v206_v32 = vmul.f32 %v373_v13, %v371_v11  ;;  %v213_v39 = vmul.f32 %v371_v11, %v189_v19  ;;  %s501_s29 = scalar_lea.hbm %s500_s28, 16  ;;  %p506_p7 = scmp.lt.s32.totalorder %s500_s28, %s729_s1 }
  0x29   : > { %v201_v30 = vmul.f32 %v372_v27, %v192_v22  ;;  %v203_v31 = vmul.f32 %v369_v9, %v192_v22  ;;  %v211_v33 = vmul.f32 %v370_v10, %v192_v22  ;;  %v199_v36 = vmul.f32 %v371_v11, %v195_v28  ;;  %p502_p4 = scmp.ne.s32.totalorder %s500_s28, %s501_s29  ;;  %p507_p8 = scmp.lt.s32.totalorder %s505_s3, %s501_s29 }
  0x2a   : > { %v176_v34 = vadd.f32 %v175_v18, %v169_v26  ;;  %v198_v35 = vadd.f32 %v197_v21, %v196_v29  ;;  %v204_v37 = vmul.f32 %v370_v10, %v195_v28  ;;  %v210_v38 = vmul.f32 %v369_v9, %v195_v28 }
  0x2b   : > { %v226_v40 = vadd.f32 %v225_v25, %v224_v24  ;;  %v227_v41 = vmul.f32 %v372_v27, %v372_v27  ;;  %v208_v44 = vmul.f32 %v372_v27, %v189_v19  ;;  %v215_v50 = vmul.f32 %v373_v13, %v372_v27  ;;  %p503_p5 = pnand %p502_p4, %p635_p9  ;;  %p508_p10 = por %p507_p8, %p506_p7 }
  0x2c   : > { %254 = vst [vmem:[%s685_s18] sm:$0xff] %v176_v34  ;;  %v200_v42 = vadd.f32 %v199_v36, %v198_v35  ;;  %v205_v43 = vsub.f32 %v203_v31, %v204_v37  ;;  %v212_v45 = vadd.f32 %v211_v33, %v210_v38 }
  0x2d   : > { %v228_v46 = vadd.f32 %v227_v41, %v226_v40  ;;  %p504_p6 = pneg %p503_p5 }
  0x2e   : > { %v207_v47 = vadd.f32 %v206_v32, %v205_v43  ;;  %v202_v48 = vsub.f32 %v200_v42, %v201_v30  ;;  %v214_v49 = vsub.f32 %v212_v45, %v213_v39 }
  0x2f   : > { %v229_v51 = vmax.f32 %v228_v46, 1e-24  ;;  %p509_p13 = pnand %p508_p10, %p504_p6 }
  0x30   : > { %v209_v52 = vadd.f32 %v208_v44, %v207_v47  ;;  %v216_v53 = vadd.f32 %v215_v50, %v214_v49  ;;  %v217_v54 = vand.u32 2147483647, %v202_v48 }
  0x31   : > { %453 = vrsqrt.f32 %v229_v51  ;;  %vm236_vm0 = vweird.f32 %v229_v51 }
  0x32   : > { %v218_v55 = vand.u32 2147483647, %v209_v52  ;;  %v220_v58 = vand.u32 2147483647, %v216_v53 }
  0x34   : > { %v219_v57 = vadd.f32 %v218_v55, %v217_v54 }
  0x36   : > { %v221_v61 = vadd.f32 %v220_v58, %v219_v57 }
  0x37   : > { %v454_v56 = vpop.eup %453 }
  0x38   : > { %v231_v59 = vmul.f32 %v454_v56, %v229_v51  ;;  %vm237_vm1 = vweird.f32 %v454_v56  ;;  %v240_v0 = vmul.f32 2.0, %v221_v61 }
  0x39   : > { %vm238_vm2 = vmor %vm236_vm0, %vm237_vm1 }
  0x3a   : > { %v232_v60 = vmul.f32 %v454_v56, %v231_v59 }
  0x3c   : > { %v233_v62 = vmul.f32 0.5, %v232_v60 }
  0x3e   : > { %v234_v63 = vsub.f32 1.5, %v233_v62 }
  0x40   : > { %v235_v1 = vmul.f32 %v454_v56, %v234_v63 }
  0x42   : > { %v239_v2 = vsel %vm238_vm2, %v454_v56, %v235_v1 }
  0x43   : > { %v241_v3 = vmul.f32 %v240_v0, %v239_v2 }
  0x45   : > { %377 = vst [vmem:[%s685_s18 + $0x8] sm:$0xff] %v241_v3 }
  0x46   : > { %512 = shalt.err (!%p509_p13)
}
  0x47   : > { %s572_s12 = smov 128   ;;  %s573_s13 = smov 8  }
  0x48   : > { %388 = dma.vmem_to_hbm [thread:$0]  (%p635_p9), %s273_s26, 256, %s275_s27, %s260_s9, %s572_s12, %s572_s12, %s573_s13  }
  0x49 PF: > { %s289_s15 = sand.u32 1, %s547_s6   ;;  %p395_p0 = pnand %p360_p12, %p642_p11 }
  0x4a   : > { %s290_s16 = scalar_lea.sflag [#allocation5], %s289_s15 }
  0x4b   : > { %p396_p1 = pneg %p395_p0 }
  0x4d   : > { %542 = dma.done.wait (%p396_p1), %s290_s16, 256  }
  0x4e   : > { %544 = vsyncadd (%p396_p1), %s290_s16, 4294967040  ;;  %s17_s11 = sadd.s32 1, %s567_s11   ;;  %s734_s6 = smov %s551_s7 }
  0x4f   : > { %p14_p2 = scmp.ge.s32.totalorder %s17_s11, 4   ;;  %s735_s7 = smov %s555_s8 }
  0x50   : > { %s736_s8 = smov %s640_s20  ;;  %s737_s9 = smov %s563_s10 }
  0x51   : > { %s738_s10 = smov %s740_s14  ;;  %16 = sbr.rel (!%p14_p2) target bundleno = 6 (0x6), region = 92 }
  0x56   :  { %296 = vsyncpa [#allocation4], 1 }
  0x57   :  { %298 = vsyncpa [#allocation4 + $0x1], 1 }
  0x58   :  { %299 = vsyncpa [#allocation5], 1 }
  0x59   :  { %301 = vsyncpa [#allocation5 + $0x1], 1 }

</bundles_post_ra>
